<compile_context>
chip_gen: v7x
topology: tpu7x:2x2x1
jax: 0.10.0
libtpu: 0.0.40
codegen_flags: <defaults>
</compile_context>

<pallas_src>
import functools

import jax
import jax.numpy as jnp
import numpy as np
from jax import lax
from jax.experimental import pallas as pl
from jax.experimental.pallas import tpu as pltpu


def _total_siamese_loss_kernel(
    y_ref,      # (B, 1)    labels (0 similar, 1 dissimilar), fetched once
    x1_ref,     # (R, TC)   image tile, set 1 (native dtype)
    x2_ref,     # (R, TC)   image tile, set 2
    x1r_ref,    # (R, TC)   reconstruction tile, set 1
    x2r_ref,    # (R, TC)   reconstruction tile, set 2
    z1_ref,     # (B, Dz)   embeddings set 1, fetched once
    z2_ref,     # (B, Dz)   embeddings set 2, fetched once
    o_ref,      # (8, 128)  per-partial output block (scalar broadcast)
    acc_ref,    # (R, TC)   f32 VMEM elementwise running sum of recon error
    *,
    recon: str,
    metric: str,
    p_norm: float,
    eps: float,
    margin: float,
    tile_cols: int,
    tiles_per_partial: int,
    col_limit: int,
    needs_mask: bool,
    inv_recon_denom: float,
):
    i = pl.program_id(0)   # partial-sum index ("parallel" -> megacore on 2-TC chips)
    j = pl.program_id(1)   # image-tile index within this partial ("arbitrary")
    f32 = jnp.float32

    @pl.when(j == 0)
    def _zero():
        acc_ref[...] = jnp.zeros_like(acc_ref)

    # ---------------- tiled pair-reconstruction accumulation -----------------
    x1 = x1_ref[...].astype(f32)
    x2 = x2_ref[...].astype(f32)
    x1r = x1r_ref[...].astype(f32)
    x2r = x2r_ref[...].astype(f32)
    d1 = x1r - x1
    d2 = x2r - x2
    if recon in ("l2", "mse"):
        vals = d1 * d1 + d2 * d2
    else:  # 'l1'
        vals = jnp.abs(d1) + jnp.abs(d2)

    if needs_mask:
        tile_idx = i * tiles_per_partial + j
        col = lax.broadcasted_iota(jnp.int32, vals.shape, 1) + tile_idx * tile_cols
        vals = jnp.where(col < col_limit, vals, 0.0)

    # Pure VPU adds per step (hidden under the DMA); no per-step XLU reduce.
    acc_ref[...] += vals

    # ---------------- finalize: reduce + normalize + contrastive -------------
    @pl.when(j == tiles_per_partial - 1)
    def _finalize():
        recon_part = jnp.sum(acc_ref[...]) * inv_recon_denom       # scalar

        z1 = z1_ref[...].astype(f32)
        z2 = z2_ref[...].astype(f32)
        if metric == "pairwise":
            diff = z1 - z2 + eps      # nn.PairwiseDistance adds eps to the diff
            if p_norm == 2.0:
                dist = jnp.sqrt(jnp.sum(diff * diff, axis=-1, keepdims=True))
            elif p_norm == 1.0:
                dist = jnp.sum(jnp.abs(diff), axis=-1, keepdims=True)
            else:
                dist = jnp.power(
                    jnp.sum(jnp.power(jnp.abs(diff), p_norm), axis=-1,
                            keepdims=True),
                    1.0 / p_norm,
                )
        else:  # 'cosine' (torch: dot / max(||z1||*||z2||, eps))
            num = jnp.sum(z1 * z2, axis=-1, keepdims=True)
            n1 = jnp.sqrt(jnp.sum(z1 * z1, axis=-1, keepdims=True))
            n2 = jnp.sqrt(jnp.sum(z2 * z2, axis=-1, keepdims=True))
            dist = num / jnp.maximum(n1 * n2, eps)

        y = y_ref[...].astype(f32)                                 # (B, 1)
        neg = jnp.maximum(margin - dist, 0.0)
        contrastive = jnp.mean((1.0 - y) * dist * dist + y * neg * neg)

        # Only partial 0 carries the contrastive term (added exactly once).
        total = recon_part + jnp.where(i == 0, contrastive, 0.0)
        o_ref[...] = jnp.broadcast_to(total, o_ref.shape)


def _round_down(x, m):
    return (x // m) * m


def _round_up(x, m):
    return ((x + m - 1) // m) * m


def _cdiv(a, b):
    return -(-a // b)


def _chip_config():
    """(num_tensorcores, per-input tile byte budget, vmem_limit cap bytes)."""
    try:
        kind = jax.devices()[0].device_kind.lower()
    except Exception:
        kind = ""
    if "v6" in kind:                         # v6e: 1 TC, 128 MiB VMEM
        return 1, 6 * 2**20, 72 * 2**20
    if "v5e" in kind or "lite" in kind:      # v5e: 1 TC, small default scoped VMEM
        return 1, 2 * 2**20, 40 * 2**20
    if "v5" in kind or "v4" in kind:         # v4/v5p megacore: 2 TCs
        return 2, 4 * 2**20, 48 * 2**20
    if "7" in kind:                          # v7x: 2 TCs, 64 MiB physical VMEM
        return 2, 2 * 2**20, 36 * 2**20
    return 1, 2 * 2**20, 32 * 2**20          # unknown: conservative


def total_siamese_loss(
    y, x1, x2, z1, z2, x1_reconstruction, x2_reconstruction,
    *,
    reconstruction_criterion: str = "mse",
    distance_metric: str = "pairwise",
    p_norm: float = 2.0,
    distance_eps: float = 1e-6,
    margin: float = 1.0,
    tile_cols=None,
):
    assert reconstruction_criterion in ("l2", "mse", "l1")
    assert distance_metric in ("pairwise", "cosine")

    B = x1.shape[0]
    d_img = int(np.prod(x1.shape[1:]))
    d_z = int(np.prod(z1.shape[1:]))
    n_elem = B * d_img
    itemsize = jnp.dtype(x1.dtype).itemsize

    n_tc, budget_bytes, vmem_cap = _chip_config()

    # ---- sublane-dense 2-D view of the image tensors (free reshape) ---------
    # Reconstruction error is a sum over all elements, so any contiguous view
    # is valid.  (8, N/8) keeps every vreg sublane packed regardless of B.
    if n_elem % 8 == 0:
        r_view = 8
    else:
        r_view = B                            # fallback: (B, d_img) view
    c_view = n_elem // r_view

    x1f = x1.reshape(r_view, c_view)
    x2f = x2.reshape(r_view, c_view)
    x1rf = x1_reconstruction.reshape(r_view, c_view)
    x2rf = x2_reconstruction.reshape(r_view, c_view)
    z1f = z1.reshape(B, d_z)
    z2f = z2.reshape(B, d_z)
    y2 = y.reshape(B, 1).astype(jnp.float32)  # tiny

    # ---- tile sizing (uses the real input itemsize) -------------------------
    if tile_cols is None:
        tc = _round_down(budget_bytes // (itemsize * max(r_view, 1)), 128)
    else:
        tc = _round_down(int(tile_cols), 128)
    tc = max(tc, 128)
    if tc >= c_view:
        tc = c_view                           # single full-extent block
    num_tiles = _cdiv(c_view, tc)

    # ---- partial-sum split over TensorCores (only if it splits evenly) ------
    if n_tc >= 2 and num_tiles > 1 and num_tiles % 2 == 1:
        tc2 = max(128, _round_up(_cdiv(c_view, num_tiles + 1), 128))
        if tc2 < c_view and _cdiv(c_view, tc2) % 2 == 0:
            tc = tc2
            num_tiles = _cdiv(c_view, tc)
    np_partials = 2 if (n_tc >= 2 and num_tiles >= 2 and num_tiles % 2 == 0) else 1
    t_per = num_tiles // np_partials
    needs_mask = (num_tiles * tc) > c_view    # ragged last tile only

    kernel = functools.partial(
        _total_siamese_loss_kernel,
        recon=reconstruction_criterion,
        metric=distance_metric,
        p_norm=float(p_norm),
        eps=float(distance_eps),
        margin=float(margin),
        tile_cols=int(tc),
        tiles_per_partial=int(t_per),
        col_limit=int(c_view),
        needs_mask=bool(needs_mask),
        inv_recon_denom=float(1.0 / n_elem),
    )

    def img_map(i, j, _t=t_per):
        return (0, i * _t + j)                # no clamp: every grid tile is real

    def const_map(i, j):
        return (0, 0)

    img_spec = pl.BlockSpec((r_view, tc), img_map)
    in_specs = [
        pl.BlockSpec((B, 1), const_map),      # y
        img_spec, img_spec, img_spec, img_spec,   # x1, x2, x1_recon, x2_recon
        pl.BlockSpec((B, d_z), const_map),    # z1
        pl.BlockSpec((B, d_z), const_map),    # z2
    ]
    out_spec = pl.BlockSpec((8, 128), lambda i, j: (i, 0))

    tile_bytes = r_view * tc * itemsize
    acc_bytes = r_view * tc * 4
    vmem_limit = int(min(vmem_cap, 4 * 2 * tile_bytes + acc_bytes + 8 * 2**20))
    vmem_limit = int(max(vmem_limit, 16 * 2**20))

    cost = pl.CostEstimate(
        flops=int(6 * n_elem + 12 * B * d_z + 8 * B),
        transcendentals=int(2 * B),
        bytes_accessed=int(4 * n_elem * itemsize
                           + 2 * B * d_z * jnp.dtype(z1.dtype).itemsize
                           + 4 * B + np_partials * 8 * 128 * 4),
    )

    out = pl.pallas_call(
        kernel,
        out_shape=jax.ShapeDtypeStruct((np_partials * 8, 128), jnp.float32),
        grid_spec=pltpu.PrefetchScalarGridSpec(
            num_scalar_prefetch=0,
            grid=(np_partials, t_per),
            in_specs=in_specs,
            out_specs=out_spec,
            scratch_shapes=[pltpu.VMEM((r_view, tc), jnp.float32)],
        ),
        compiler_params=pltpu.CompilerParams(
            dimension_semantics=("parallel", "arbitrary"),
            vmem_limit_bytes=vmem_limit,
        ),
        cost_estimate=cost,
    )(y2, x1f, x2f, x1rf, x2rf, z1f, z2f)

    # Sum the per-partial broadcast scalars (contrastive lives only in partial 0).
    return jnp.sum(out[::8, 0])


def _reference_jax(y, x1, x2, z1, z2, x1r, x2r, *, recon, metric, p, eps, margin):
    """Pure-JAX reference mirroring the PyTorch semantics."""
    f32 = jnp.float32
    x1 = x1.astype(f32); x2 = x2.astype(f32)
    x1r = x1r.astype(f32); x2r = x2r.astype(f32)
    if recon in ("l2", "mse"):
        rloss = jnp.mean((x1r - x1) ** 2) + jnp.mean((x2r - x2) ** 2)
    else:
        rloss = jnp.mean(jnp.abs(x1r - x1)) + jnp.mean(jnp.abs(x2r - x2))
    B = z1.shape[0]
    z1f = z1.reshape(B, -1).astype(f32)
    z2f = z2.reshape(B, -1).astype(f32)
    if metric == "pairwise":
        diff = z1f - z2f + eps
        d = jnp.power(jnp.sum(jnp.abs(diff) ** p, axis=-1), 1.0 / p)
    else:
        num = jnp.sum(z1f * z2f, axis=-1)
        den = jnp.maximum(
            jnp.linalg.norm(z1f, axis=-1) * jnp.linalg.norm(z2f, axis=-1), eps)
        d = num / den
    yf = y.reshape(B).astype(f32)
    closs = jnp.mean((1.0 - yf) * d ** 2 + yf * jnp.maximum(margin - d, 0.0) ** 2)
    return rloss + closs


def _run_case(key, *, B, C, H, W, Dz, img_dtype, recon, metric, p, tile_cols):
    kx1, kx2, kz1, kz2, kr1, kr2, ky = jax.random.split(key, 7)
    x1 = jax.random.normal(kx1, (B, C, H, W), dtype=jnp.float32).astype(img_dtype)
    x2 = jax.random.normal(kx2, (B, C, H, W), dtype=jnp.float32).astype(img_dtype)
    x1r = (x1.astype(jnp.float32)
           + 0.1 * jax.random.normal(kr1, (B, C, H, W), dtype=jnp.float32)
           ).astype(img_dtype)
    x2r = (x2.astype(jnp.float32)
           + 0.1 * jax.random.normal(kr2, (B, C, H, W), dtype=jnp.float32)
           ).astype(img_dtype)
    z1 = jax.random.normal(kz1, (B, Dz), dtype=jnp.float32)
    z2 = jax.random.normal(kz2, (B, Dz), dtype=jnp.float32)
    y = jax.random.bernoulli(ky, 0.5, (B,)).astype(jnp.float32)

    loss = total_siamese_loss(
        y, x1, x2, z1, z2, x1r, x2r,
        reconstruction_criterion=recon, distance_metric=metric,
        p_norm=p, distance_eps=1e-6, margin=1.0, tile_cols=tile_cols)
    loss = jax.block_until_ready(loss)

    ref = _reference_jax(y, x1, x2, z1, z2, x1r, x2r,
                         recon=recon, metric=metric, p=p, eps=1e-6, margin=1.0)
    np.testing.assert_allclose(np.asarray(loss), np.asarray(ref),
                               rtol=2e-5, atol=2e-5)


if __name__ == "__main__":
    root = jax.random.PRNGKey(0)
    k1, k2, k3, k4 = jax.random.split(root, 4)

    # 1) Default tiling (single full-extent tile, grid (1,1)), f32 images.
    _run_case(k1, B=2, C=4, H=16, W=16, Dz=32, img_dtype=jnp.float32,
              recon="mse", metric="pairwise", p=2.0, tile_cols=None)

    # 2) Forced even tiling (c_view=256 -> 2 tiles of 128) with bf16 images:
    #    exercises the in-kernel upcast, multi-tile vector accumulation and the
    #    2-partial split on multi-TC chips.
    _run_case(k2, B=2, C=4, H=16, W=16, Dz=32, img_dtype=jnp.bfloat16,
              recon="mse", metric="pairwise", p=2.0, tile_cols=128)

    # 3) Ragged tiling (c_view=288 -> 3 tiles of 128, masked tail) with L1
    #    reconstruction + cosine distance.
    _run_case(k3, B=2, C=2, H=24, W=24, Dz=32, img_dtype=jnp.float32,
              recon="l1", metric="cosine", p=2.0, tile_cols=128)

    # 4) Fallback layout (n_elem % 8 != 0 -> (B, d_img) view), single tile.
    _run_case(k4, B=1, C=3, H=5, W=5, Dz=16, img_dtype=jnp.float32,
              recon="mse", metric="pairwise", p=2.0, tile_cols=None)

    print("KERNEL_OK")
</pallas_src>

<mosaic_0001>
module attributes {stable_mosaic.version = 11 : i64} {
  func.func @_total_siamese_loss_kernel(%arg0: i32, %arg1: i32, %arg2: memref<2x1xf32, #tpu.memory_space<vmem>>, %arg3: memref<8x256xf32, #tpu.memory_space<vmem>>, %arg4: memref<8x256xf32, #tpu.memory_space<vmem>>, %arg5: memref<8x256xf32, #tpu.memory_space<vmem>>, %arg6: memref<8x256xf32, #tpu.memory_space<vmem>>, %arg7: memref<2x32xf32, #tpu.memory_space<vmem>>, %arg8: memref<2x32xf32, #tpu.memory_space<vmem>>, %arg9: memref<8x128xf32, #tpu.memory_space<vmem>>, %arg10: memref<8x256xf32, #tpu.memory_space<vmem>>) attributes {dimension_semantics = [#tpu.dimension_semantics<parallel>, #tpu.dimension_semantics<arbitrary>], iteration_bounds = array<i64: 1, 1>, scalar_prefetch = 0 : i64, scratch_operands = 1 : i64, tpu.core_type = #tpu.core_type<tc>, window_params = [{pipeline_mode = #tpu.pipeline_mode<synchronous>, transform_indices = @transform_0, window_bounds = array<i64: 2, 1>}, {transform_indices = @transform_1, window_bounds = array<i64: 8, 256>}, {transform_indices = @transform_2, window_bounds = array<i64: 8, 256>}, {transform_indices = @transform_3, window_bounds = array<i64: 8, 256>}, {transform_indices = @transform_4, window_bounds = array<i64: 8, 256>}, {pipeline_mode = #tpu.pipeline_mode<synchronous>, transform_indices = @transform_5, window_bounds = array<i64: 2, 32>}, {pipeline_mode = #tpu.pipeline_mode<synchronous>, transform_indices = @transform_6, window_bounds = array<i64: 2, 32>}, {transform_indices = @transform_7, window_bounds = array<i64: 8, 128>}]} {
    %c0_i32 = arith.constant 0 : i32
    %0 = arith.cmpi eq, %arg1, %c0_i32 : i32
    %1 = arith.extui %0 : i1 to i32
    %c0_i32_0 = arith.constant 0 : i32
    %2 = arith.cmpi ne, %1, %c0_i32_0 : i32
    scf.if %2 {
      %cst = arith.constant 0.000000e+00 : f32
      %18 = vector.broadcast %cst : f32 to vector<8x256xf32>
      %c0_14 = arith.constant 0 : index
      %c0_15 = arith.constant 0 : index
      %19 = vector.load %arg10[%c0_14, %c0_15] : memref<8x256xf32, #tpu.memory_space<vmem>>, vector<8x256xf32>
      tpu.vector_store %arg10[%c0_14, %c0_15], %18 {strides = array<i32>} : memref<8x256xf32, #tpu.memory_space<vmem>>, vector<8x256xf32>,
    } else {
    }
    %c0 = arith.constant 0 : index
    %c0_1 = arith.constant 0 : index
    %3 = vector.load %arg3[%c0, %c0_1] : memref<8x256xf32, #tpu.memory_space<vmem>>, vector<8x256xf32>
    %c0_2 = arith.constant 0 : index
    %c0_3 = arith.constant 0 : index
    %4 = vector.load %arg4[%c0_2, %c0_3] : memref<8x256xf32, #tpu.memory_space<vmem>>, vector<8x256xf32>
    %c0_4 = arith.constant 0 : index
    %c0_5 = arith.constant 0 : index
    %5 = vector.load %arg5[%c0_4, %c0_5] : memref<8x256xf32, #tpu.memory_space<vmem>>, vector<8x256xf32>
    %c0_6 = arith.constant 0 : index
    %c0_7 = arith.constant 0 : index
    %6 = vector.load %arg6[%c0_6, %c0_7] : memref<8x256xf32, #tpu.memory_space<vmem>>, vector<8x256xf32>
    %7 = arith.subf %5, %3 : vector<8x256xf32>
    %8 = arith.subf %6, %4 : vector<8x256xf32>
    %9 = arith.mulf %7, %7 : vector<8x256xf32>
    %10 = arith.mulf %8, %8 : vector<8x256xf32>
    %11 = arith.addf %9, %10 : vector<8x256xf32>
    %c0_8 = arith.constant 0 : index
    %c0_9 = arith.constant 0 : index
    %12 = vector.load %arg10[%c0_8, %c0_9] : memref<8x256xf32, #tpu.memory_space<vmem>>, vector<8x256xf32>
    %13 = arith.addf %12, %11 : vector<8x256xf32>
    %c0_10 = arith.constant 0 : index
    %c0_11 = arith.constant 0 : index
    %14 = vector.load %arg10[%c0_10, %c0_11] : memref<8x256xf32, #tpu.memory_space<vmem>>, vector<8x256xf32>
    tpu.vector_store %arg10[%c0_10, %c0_11], %13 {strides = array<i32>} : memref<8x256xf32, #tpu.memory_space<vmem>>, vector<8x256xf32>,
    %c0_i32_12 = arith.constant 0 : i32
    %15 = arith.cmpi eq, %arg1, %c0_i32_12 : i32
    %16 = arith.extui %15 : i1 to i32
    %c0_i32_13 = arith.constant 0 : i32
    %17 = arith.cmpi ne, %16, %c0_i32_13 : i32
    scf.if %17 {
      %c0_14 = arith.constant 0 : index
      %c0_15 = arith.constant 0 : index
      %18 = vector.load %arg10[%c0_14, %c0_15] : memref<8x256xf32, #tpu.memory_space<vmem>>, vector<8x256xf32>
      %19 = vector.shape_cast %18 : vector<8x256xf32> to vector<1x8x256xf32>
      %cst = arith.constant dense<0.000000e+00> : vector<1xf32>
      %20 = vector.multi_reduction <add>, %19, %cst [1, 2] : vector<1x8x256xf32> to vector<1xf32>
      %21 = vector.shape_cast %20 : vector<1xf32> to vector<1x1x1xf32>
      %22 = vector.extract %21[0, 0, 0] : f32 from vector<1x1x1xf32>
      %cst_16 = arith.constant 4.8828125E-4 : f32
      %23 = arith.mulf %22, %cst_16 : f32
      %c0_17 = arith.constant 0 : index
      %c0_18 = arith.constant 0 : index
      %24 = vector.load %arg7[%c0_17, %c0_18] : memref<2x32xf32, #tpu.memory_space<vmem>>, vector<2x32xf32>
      %c0_19 = arith.constant 0 : index
      %c0_20 = arith.constant 0 : index
      %25 = vector.load %arg8[%c0_19, %c0_20] : memref<2x32xf32, #tpu.memory_space<vmem>>, vector<2x32xf32>
      %26 = arith.subf %24, %25 : vector<2x32xf32>
      %cst_21 = arith.constant 9.99999997E-7 : f32
      %27 = vector.broadcast %cst_21 : f32 to vector<2x32xf32>
      %28 = arith.addf %26, %27 : vector<2x32xf32>
      %29 = arith.mulf %28, %28 : vector<2x32xf32>
      %cst_22 = arith.constant dense<0.000000e+00> : vector<2xf32>
      %30 = vector.multi_reduction <add>, %29, %cst_22 [1] : vector<2x32xf32> to vector<2xf32>
      %31 = vector.shape_cast %30 : vector<2xf32> to vector<2x1xf32>
      %32 = math.sqrt %31 : vector<2x1xf32>
      %c0_23 = arith.constant 0 : index
      %c0_24 = arith.constant 0 : index
      %33 = vector.load %arg2[%c0_23, %c0_24] : memref<2x1xf32, #tpu.memory_space<vmem>>, vector<2x1xf32>
      %cst_25 = arith.constant 1.000000e+00 : f32
      %34 = vector.broadcast %cst_25 : f32 to vector<2x1xf32>
      %35 = arith.subf %34, %32 : vector<2x1xf32>
      %cst_26 = arith.constant 0.000000e+00 : f32
      %36 = vector.broadcast %cst_26 : f32 to vector<2x1xf32>
      %37 = arith.maximumf %35, %36 : vector<2x1xf32>
      %cst_27 = arith.constant 1.000000e+00 : f32
      %38 = vector.broadcast %cst_27 : f32 to vector<2x1xf32>
      %39 = arith.subf %38, %33 : vector<2x1xf32>
      %40 = arith.mulf %39, %32 : vector<2x1xf32>
      %41 = arith.mulf %40, %32 : vector<2x1xf32>
      %42 = arith.mulf %33, %37 : vector<2x1xf32>
      %43 = arith.mulf %42, %37 : vector<2x1xf32>
      %44 = arith.addf %41, %43 : vector<2x1xf32>
      %45 = vector.shape_cast %44 : vector<2x1xf32> to vector<1x2x1xf32>
      %cst_28 = arith.constant dense<0.000000e+00> : vector<1xf32>
      %46 = vector.multi_reduction <add>, %45, %cst_28 [1, 2] : vector<1x2x1xf32> to vector<1xf32>
      %47 = vector.shape_cast %46 : vector<1xf32> to vector<1x1x1xf32>
      %48 = vector.extract %47[0, 0, 0] : f32 from vector<1x1x1xf32>
      %cst_29 = arith.constant 2.000000e+00 : f32
      %49 = arith.divf %48, %cst_29 : f32
      %c0_i32_30 = arith.constant 0 : i32
      %50 = arith.cmpi eq, %arg0, %c0_i32_30 : i32
      %cst_31 = arith.constant 0.000000e+00 : f32
      %51 = arith.select %50, %49, %cst_31 : f32
      %52 = arith.addf %23, %51 : f32
      %53 = vector.broadcast %52 : f32 to vector<8x128xf32>
      %c0_32 = arith.constant 0 : index
      %c0_33 = arith.constant 0 : index
      %54 = vector.load %arg9[%c0_32, %c0_33] : memref<8x128xf32, #tpu.memory_space<vmem>>, vector<8x128xf32>
      tpu.vector_store %arg9[%c0_32, %c0_33], %53 {strides = array<i32>} : memref<8x128xf32, #tpu.memory_space<vmem>>, vector<8x128xf32>,
    } else {
    }
    return
  }
  func.func @transform_0(%arg0: i32, %arg1: i32) -> (i32, i32) {
    %c0_i32 = arith.constant 0 : i32
    %c0_i32_0 = arith.constant 0 : i32
    %c0_i32_1 = arith.constant 0 : i32
    return %c0_i32, %c0_i32_0 : i32, i32
  }
  func.func @transform_1(%arg0: i32, %arg1: i32) -> (i32, i32) {
    %c1_i32 = arith.constant 1 : i32
    %0 = arith.muli %arg0, %c1_i32 : i32
    %1 = arith.addi %0, %arg1 : i32
    %c0_i32 = arith.constant 0 : i32
    %c0_i32_0 = arith.constant 0 : i32
    return %c0_i32, %1 : i32, i32
  }
  func.func @transform_2(%arg0: i32, %arg1: i32) -> (i32, i32) {
    %c1_i32 = arith.constant 1 : i32
    %0 = arith.muli %arg0, %c1_i32 : i32
    %1 = arith.addi %0, %arg1 : i32
    %c0_i32 = arith.constant 0 : i32
    %c0_i32_0 = arith.constant 0 : i32
    return %c0_i32, %1 : i32, i32
  }
  func.func @transform_3(%arg0: i32, %arg1: i32) -> (i32, i32) {
    %c1_i32 = arith.constant 1 : i32
    %0 = arith.muli %arg0, %c1_i32 : i32
    %1 = arith.addi %0, %arg1 : i32
    %c0_i32 = arith.constant 0 : i32
    %c0_i32_0 = arith.constant 0 : i32
    return %c0_i32, %1 : i32, i32
  }
  func.func @transform_4(%arg0: i32, %arg1: i32) -> (i32, i32) {
    %c1_i32 = arith.constant 1 : i32
    %0 = arith.muli %arg0, %c1_i32 : i32
    %1 = arith.addi %0, %arg1 : i32
    %c0_i32 = arith.constant 0 : i32
    %c0_i32_0 = arith.constant 0 : i32
    return %c0_i32, %1 : i32, i32
  }
  func.func @transform_5(%arg0: i32, %arg1: i32) -> (i32, i32) {
    %c0_i32 = arith.constant 0 : i32
    %c0_i32_0 = arith.constant 0 : i32
    %c0_i32_1 = arith.constant 0 : i32
    return %c0_i32, %c0_i32_0 : i32, i32
  }
  func.func @transform_6(%arg0: i32, %arg1: i32) -> (i32, i32) {
    %c0_i32 = arith.constant 0 : i32
    %c0_i32_0 = arith.constant 0 : i32
    %c0_i32_1 = arith.constant 0 : i32
    return %c0_i32, %c0_i32_0 : i32, i32
  }
  func.func @transform_7(%arg0: i32, %arg1: i32) -> (i32, i32) {
    %c0_i32 = arith.constant 0 : i32
    %c0_i32_0 = arith.constant 0 : i32
    return %arg0, %c0_i32 : i32, i32
  }
}

</mosaic_0001>

<bundles_post_ra>
// kernel: tpu_custom_call.1
= control target key start
LH: loop header
LB: loop body
LE: loop exit
PB: predicated region body
PF: predicated region fallthrough
CT: control target
= control target key end

     0   :  { %12 = vsyncpa [#allocation4], 0  ;;  %s425_s0 = inlined_call_operand.vmem [shape: f32[2,1], index: 0, kind: input, shape index: {}]   ;;  %s426_s1 = inlined_call_operand.hbm [shape: f32[8,256], index: 1, kind: input, shape index: {}]   ;;  %s427_s2 = inlined_call_operand.hbm [shape: f32[8,256], index: 2, kind: input, shape index: {}]   ;;  %s428_s3 = inlined_call_operand.hbm [shape: f32[8,256], index: 3, kind: input, shape index: {}]   ;;  %s429_s4 = inlined_call_operand.vmem [shape: f32[8,256], index: 4, kind: input, shape index: {}]   ;;  %s430_s5 = inlined_call_operand.vmem [shape: f32[2,32], index: 5, kind: input, shape index: {}]   ;;  %s431_s6 = inlined_call_operand.vmem [shape: f32[2,32], index: 6, kind: input, shape index: {}]   ;;  %s432_s7 = inlined_call_operand.hbm [shape: f32[8,128], index: 7, kind: output, shape index: {}]  }
   0x1   :  { %13 = vsyncpa [#allocation7], 0 }
   0x2   :  { %14 = vsyncpa [#allocation5], 0  ;;  %s318_s24 = smov [#allocation6]   ;;  %s319_s26 = smov [#allocation3]  }
   0x3   :  { %s41_s25 = sshll.u32 %s318_s24, 4  ;;  %s27_s27 = sshll.u32 %s319_s26, 4  ;;  %s42_s25 = int_to_ptr.vmem [resolvable:$true] %s41_s25  ;;  %s28_s27 = int_to_ptr.vmem [resolvable:$true] %s27_s27 }
   0x4   :  { %s224_s30 = scalar_lea.hbm %s427_s2, 256 }
   0x5   :  { %p225_p0 = scmp.ne.s32.totalorder %s427_s2, %s224_s30  ;;  %p228_p1 = scmp.lt.u32.totalorder %s224_s30, %s427_s2 }
   0x7   :  { %p230_p2 = pnand %p228_p1, %p225_p0 }
   0x9   :  { %233 = shalt.err (!%p230_p2)
}
   0xa   :  { %s234_s12 = scalar_lea.vmem %s42_s25, 256  ;;  %p239_p4 = scmp.lt.s32.totalorder %s42_s25, %s42_s25 }
   0xb   :  { %p235_p3 = scmp.ne.s32.totalorder %s42_s25, %s234_s12  ;;  %p240_p5 = scmp.lt.s32.totalorder %s234_s12, %s234_s12 }
   0xd   :  { %p241_p6 = por %p240_p5, %p239_p4 }
   0xf   :  { %p242_p7 = pnand %p241_p6, %p235_p3 }
  0x11   :  { %245 = shalt.err (!%p242_p7)
}
  0x12   :  { %44 = dma.hbm_to_vmem [thread:$0]  %s427_s2, 256, %s42_s25, [#allocation7]  }
  0x13   :  { %s246_s17 = scalar_lea.hbm %s426_s1, 256 }
  0x14   :  { %p247_p8 = scmp.ne.s32.totalorder %s426_s1, %s246_s17  ;;  %p250_p9 = scmp.lt.u32.totalorder %s246_s17, %s426_s1 }
  0x16   :  { %p252_p10 = pnand %p250_p9, %p247_p8 }
  0x18   :  { %255 = shalt.err (!%p252_p10)
}
  0x19   :  { %s256_s22 = scalar_lea.vmem %s28_s27, 256  ;;  %p261_p12 = scmp.lt.s32.totalorder %s28_s27, %s28_s27 }
  0x1a   :  { %p257_p11 = scmp.ne.s32.totalorder %s28_s27, %s256_s22  ;;  %p262_p13 = scmp.lt.s32.totalorder %s256_s22, %s256_s22 }
  0x1c   :  { %p263_p0 = por %p262_p13, %p261_p12 }
  0x1e   :  { %p264_p1 = pnand %p263_p0, %p257_p11 }
  0x20   :  { %267 = shalt.err (!%p264_p1)
}
  0x21   :  { %30 = dma.hbm_to_vmem [thread:$0]  %s426_s1, 256, %s28_s27, [#allocation4]  }
  0x22   :  { %s320_s24 = smov [#allocation8]   ;;  %s268_s29 = scalar_lea.hbm %s428_s3, 256 }
  0x23   :  { %s55_s25 = sshll.u32 %s320_s24, 4  ;;  %p269_p2 = scmp.ne.s32.totalorder %s428_s3, %s268_s29  ;;  %s56_s25 = int_to_ptr.vmem [resolvable:$true] %s55_s25 }
  0x24   :  { %p272_p3 = scmp.lt.u32.totalorder %s268_s29, %s428_s3 }
  0x26   :  { %p274_p4 = pnand %p272_p3, %p269_p2 }
  0x28   :  { %277 = shalt.err (!%p274_p4)
}
  0x29   :  { %s278_s11 = scalar_lea.vmem %s56_s25, 256  ;;  %p283_p6 = scmp.lt.s32.totalorder %s56_s25, %s56_s25 }
  0x2a   :  { %p279_p5 = scmp.ne.s32.totalorder %s56_s25, %s278_s11  ;;  %p284_p7 = scmp.lt.s32.totalorder %s278_s11, %s278_s11 }
  0x2c   :  { %p285_p8 = por %p284_p7, %p283_p6 }
  0x2e   :  { %p286_p9 = pnand %p285_p8, %p279_p5 }
  0x30   :  { %289 = shalt.err (!%p286_p9)
}
  0x31   :  { %58 = dma.hbm_to_vmem [thread:$0]  %s428_s3, 256, %s56_s25, [#allocation7]  }
  0x32   :  { %312 = dma.done.wait [#allocation4], 256  }
  0x33   :  { %313 = vsyncadd [#allocation4], 4294967040 }
  0x34   :  { %314 = dma.done.wait [#allocation7], 512  }
  0x35   :  { %315 = vsyncadd [#allocation7], 4294966784  ;;  %v148_v0 = vld [vmem:[%s430_s5] sm:$0x3]  ;;  %vm153_vm0 = vcmask 254976   ;;  %v108_v6 = vld [vmem:[#allocation3] sm:$0xff] }
  0x36   :  { %v149_v1 = vld [vmem:[%s431_s6] sm:$0x3]  ;;  %v110_v8 = vld [vmem:[#allocation6] sm:$0xff]  ;;  %v111_v9 = vld [vmem:[#allocation6 + $0x8] sm:$0xff]  ;;  %vm173_vm3 = vcmask 1024   ;;  %s321_s21 = smov [#allocation9]  }
  0x37   :  { %v150_v2 = vsub.f32 %v148_v0, %v149_v1  ;;  %v109_v7 = vld [vmem:[#allocation3 + $0x8] sm:$0xff]  ;;  %v112_v10 = vld [vmem:[#allocation8] sm:$0xff]  ;;  %v115_v13 = vld [vmem:[%s429_s4 + $0x8] sm:$0xff]  ;;  %s198_s22 = sshll.u32 %s321_s21, 4  ;;  %s199_s22 = int_to_ptr.vmem [resolvable:$true] %s198_s22 }
  0x38   :  { %v113_v11 = vld [vmem:[#allocation8 + $0x8] sm:$0xff]  ;;  %v116_v14 = vsub.f32 %v112_v10, %v108_v6  ;;  %v119_v17 = vsub.f32 %v115_v13, %v111_v9  ;;  %s290_s23 = scalar_lea.vmem %s199_s22, 128  ;;  %p295_p11 = scmp.lt.s32.totalorder %s199_s22, %s199_s22 }
  0x39   :  { %v151_v3 = vadd.f32 1e-06, %v150_v2  ;;  %v114_v12 = vld [vmem:[%s429_s4] sm:$0xff]  ;;  %v117_v15 = vsub.f32 %v113_v11, %v109_v7  ;;  %p291_p10 = scmp.ne.s32.totalorder %s199_s22, %s290_s23  ;;  %p296_p12 = scmp.lt.s32.totalorder %s290_s23, %s290_s23 }
  0x3a   :  { %v118_v16 = vsub.f32 %v114_v12, %v110_v8  ;;  %v120_v18 = vmul.f32 %v116_v14, %v116_v14  ;;  %v123_v21 = vmul.f32 %v119_v17, %v119_v17  ;;  %v164_v27 = vld [vmem:[%s425_s0] sm:$0x3] }
  0x3b   :  { %v152_v4 = vmul.f32 %v151_v3, %v151_v3  ;;  %v121_v19 = vmul.f32 %v117_v15, %v117_v15  ;;  %v167_v31 = vsub.f32 1.0, %v164_v27  ;;  %p297_p13 = por %p296_p12, %p295_p11 }
  0x3c   :  { %v122_v20 = vmul.f32 %v118_v16, %v118_v16 }
  0x3d   :  { %v154_v5 = vsel %vm153_vm0, %v152_v4, 0.0  ;;  %v125_v23 = vadd.f32 %v123_v21, %v121_v19  ;;  %p298_p0 = pnand %p297_p13, %p291_p10 }
  0x3e   :  { %155 = vadd.xlane.f32.xlu0 %v154_v5  ;;  %v124_v22 = vadd.f32 %v122_v20, %v120_v18 }
  0x40   :  { %v137_v24 = vadd.f32 %v125_v23, %v124_v22 }
  0x42   :  { %138 = vadd.xlane.f32.xlu0 %v137_v24 }
  0xcb   :  { %v156_v25 = vpop.xlane.xlu0 %155 }
  0xcc   :  { %222 = vrsqrt.f32 %v156_v25  ;;  %vm159_vm1 = vcmp.eq.f32.partialorder %v156_v25, inf  ;;  %v162_v29 = vand.u32 2147483648, %v156_v25  ;;  %vm161_vm2 = vcmp.eq.f32.partialorder %v156_v25, 0.0 }
  0xcf   :  { %v139_v41 = vpop.xlane.xlu0 %138 }
  0xd0   :  { %v140_v42 = vrot.slane %v139_v41, 4 }
  0xd2   :  { %v141_v43 = vadd.f32 %v140_v42, %v139_v41 }
  0xd4   :  { %v142_v44 = vrot.slane %v141_v43, 2 }
  0xd6   :  { %v223_v26 = vpop.eup %222  ;;  %v143_v45 = vadd.f32 %v142_v44, %v141_v43 }
  0xd7   :  { %v158_v28 = vmul.f32 %v223_v26, %v156_v25 }
  0xd8   :  { %v144_v46 = vrot.slane %v143_v45, 1 }
  0xd9   :  { %v160_v30 = vsel %vm159_vm1, %v156_v25, %v158_v28 }
  0xda   :  { %v163_v32 = vsel %vm161_vm2, %v162_v29, %v160_v30  ;;  %v145_v47 = vadd.f32 %v144_v46, %v143_v45 }
  0xdb   :  { %v165_v33 = vsub.f32 1.0, %v163_v32  ;;  %v168_v35 = vmul.f32 %v167_v31, %v163_v32 }
  0xdc   :  { %214 = vpush %v145_v47 }
  0xdd   :  { %v166_v34 = vmax.f32 %v165_v33, 0.0  ;;  %v169_v37 = vmul.f32 %v168_v35, %v163_v32 }
  0xdf   :  { %v170_v36 = vmul.f32 %v166_v34, %v164_v27 }
  0xe1   :  { %v171_v38 = vmul.f32 %v170_v36, %v166_v34 }
  0xe3   :  { %v172_v39 = vadd.f32 %v171_v38, %v169_v37 }
  0xe5   :  { %v174_v40 = vsel %vm173_vm3, %v172_v39, 0.0 }
  0xe6   :  { %175 = vadd.xlane.f32.xlu1 %v174_v40 }
 0x10d   :  { %s215_s0 = spop %214 }
 0x10e   :  { %s147_s4 = smul.f32 0.00048828125, %s215_s0 }
 0x173   :  { %v176_v48 = vpop.xlane.xlu1 %175 }
 0x174   :  { %v177_v49 = vrot.slane %v176_v48, 4 }
 0x176   :  { %v178_v50 = vadd.f32 %v177_v49, %v176_v48 }
 0x178   :  { %v179_v51 = vrot.slane %v178_v50, 2 }
 0x17a   :  { %v180_v52 = vadd.f32 %v179_v51, %v178_v50 }
 0x17c   :  { %v181_v53 = vrot.slane %v180_v52, 1 }
 0x17e   :  { %v182_v54 = vadd.f32 %v181_v53, %v180_v52 }
 0x180   :  { %216 = vpush %v182_v54 }
 0x1b1   :  { %s217_s19 = spop %216 }
 0x1b2   :  { %s186_s20 = smul.f32 0.5, %s217_s19 }
 0x1b4   :  { %s189_s2 = sadd.f32 %s186_s20, %s147_s4 }
 0x1b6   :  { %v190_v55 = vstv %s189_s2 }
 0x1b7   :  { %191 = vst [vmem:[#allocation9] sm:$0xff] %v190_v55 }
 0x1b8   :  { %301 = shalt.err (!%p298_p0)
}
 0x1b9   :  { %s302_s26 = scalar_lea.hbm %s432_s7, 128 }
 0x1ba   :  { %p303_p1 = scmp.ne.s32.totalorder %s432_s7, %s302_s26  ;;  %p306_p2 = scmp.lt.u32.totalorder %s302_s26, %s432_s7 }
 0x1bc   :  { %p308_p3 = pnand %p306_p2, %p303_p1 }
 0x1be   :  { %311 = shalt.err (!%p308_p3)
}
 0x1bf   :  { %201 = dma.vmem_to_hbm [thread:$0]  %s199_s22, 128, %s432_s7, [#allocation5]  }
 0x1c0   :  { %316 = dma.done.wait [#allocation5], 128  }
 0x1c1   :  { %317 = vsyncadd [#allocation5], 4294967168 }
 0x1c2   :  { %205 = vsyncpa [#allocation4], 1 }
 0x1c3   :  { %206 = vsyncpa [#allocation7], 1 }
 0x1c4   :  { %207 = vsyncpa [#allocation5], 1 }

</bundles_post_ra>
